<compile_context>
chip_gen: v5e
topology: v5e:2x2
jax: 0.10.0
libtpu: 0.0.40
codegen_flags: <defaults>
</compile_context>

<pallas_src>
import functools
import math

import jax
import jax.numpy as jnp
from jax.experimental import pallas as pl
from jax.experimental.pallas import tpu as pltpu

_LANE = 128
_SUBLANE = 8
_MIB = 1024 * 1024


def _round_up(x, m):
    return ((x + m - 1) // m) * m


def _pick_tile(dim_pad, target):
    """Largest multiple of 128 <= target that divides dim_pad (dim_pad % 128 == 0)."""
    t = min(target, dim_pad)
    while dim_pad % t:
        t -= _LANE
    return t


def _pad_rows_cols(a, rows, cols):
    r, c = a.shape
    if r == rows and c == cols:
        return a
    return jnp.pad(a, ((0, rows - r), (0, cols - c)))


@functools.lru_cache(maxsize=None)
def _physical_vmem_bytes():
    """Per-TensorCore VMEM capacity; conservative 64 MiB (v7x) if unknown."""
    try:
        info = pltpu.get_tpu_info()
        for name in ("vmem_capacity_bytes", "vmem_size_bytes", "vmem_bytes"):
            v = getattr(info, name, None)
            if v:
                return int(v)
    except Exception:
        pass
    return 64 * _MIB


@functools.lru_cache(maxsize=None)
def _vmem_budgets():
    """(scoped vmem_limit_bytes, fused-path resident budget) per generation.

    v5e/v6e (128 MiB physical) -> 96 MiB limit / 72 MiB fused budget.
    v7x     ( 64 MiB physical) -> 48 MiB limit / 36 MiB fused budget.
    """
    phys = _physical_vmem_bytes()
    limit = max(32 * _MIB, min(int(phys * 0.75), 100 * _MIB))
    fused_budget = int(limit * 0.75)
    return limit, fused_budget


# ---------------------------------------------------------------------------
# Fused whole-MLP kernel (weights resident in VMEM, activations never hit HBM)
# ---------------------------------------------------------------------------
def _make_fused_mlp_kernel(n_layers):
    def kernel(*refs):
        x_ref = refs[0]
        w_refs = refs[1:1 + n_layers]
        b_refs = refs[1 + n_layers:1 + 2 * n_layers]
        o_ref = refs[1 + 2 * n_layers]

        h = x_ref[...].astype(jnp.bfloat16)                # MXU input dtype
        y = None
        for l in range(n_layers):
            y = jnp.dot(h, w_refs[l][...],
                        preferred_element_type=jnp.float32)  # f32 accumulate
            y = jnp.maximum(y + b_refs[l][...], 0.0)          # bias + ReLU (VPU)
            if l + 1 < n_layers:
                h = y.astype(jnp.bfloat16)                    # feed next layer
        o_ref[...] = y.astype(o_ref.dtype)
    return kernel


def _fused_act_bytes(tm, dims_pad):
    """Activation VMEM footprint for a batch tile of tm rows."""
    # x tile (f32) and out tile (f32) are double-buffered by the pipeline.
    io = 2 * tm * dims_pad[0] * 4 + 2 * tm * dims_pad[-1] * 4
    # Widest simultaneously-live pair: bf16 matmul input + f32 matmul output.
    pair = max(tm * (dims_pad[l] * 2 + dims_pad[l + 1] * 4)
               for l in range(len(dims_pad) - 1))
    return io + pair


def _fused_plan(M, in_features, params):
    """Return (tm, m_pad, dims_pad, vmem_limit) for the fused path, or None."""
    limit, budget = _vmem_budgets()
    dims = [in_features] + [w.shape[1] for w, _ in params]
    dims_pad = [_round_up(d, _LANE) for d in dims]

    # Weights/biases use pl.Buffered(1) -> single resident copy (no 2x).
    weight_bytes = sum(dims_pad[l] * dims_pad[l + 1] * 2 for l in range(len(params)))
    bias_bytes = sum(d * 4 for d in dims_pad[1:])
    act_budget = budget - weight_bytes - bias_bytes
    if act_budget <= 0:
        return None

    m_ceil = _round_up(max(M, 1), _SUBLANE)
    tm = min(512, m_ceil)
    while tm > _SUBLANE and _fused_act_bytes(tm, dims_pad) > act_budget:
        tm = _round_up(tm // 2, _SUBLANE)
    if _fused_act_bytes(tm, dims_pad) > act_budget:
        return None

    # Prefer >= 2 batch tiles so the "parallel" axis can shard across v7x's
    # two TensorCores (negligible ~0.35us/step cost on single-TC chips).
    if m_ceil > _SUBLANE and m_ceil <= tm:
        tm = _round_up((m_ceil + 1) // 2, _SUBLANE)
    m_pad = _round_up(m_ceil, tm)
    return tm, m_pad, dims_pad, limit


def _fused_mlp(x, params, plan):
    tm, m_pad, dims_pad, vmem_limit = plan
    M = x.shape[0]
    n_layers = len(params)
    out_features = params[-1][0].shape[1]

    x_p = _pad_rows_cols(x, m_pad, dims_pad[0])
    ws_p = [_pad_rows_cols(w, dims_pad[l], dims_pad[l + 1])
            for l, (w, _) in enumerate(params)]
    bs_p = [jnp.pad(b, (0, dims_pad[l + 1] - b.shape[0])).reshape(1, -1)
            for l, (_, b) in enumerate(params)]

    resident = pl.Buffered(1)   # grid-invariant blocks: one VMEM copy, no double-buffer
    in_specs = [pl.BlockSpec((tm, dims_pad[0]), lambda i: (i, 0))]
    for l in range(n_layers):   # weights: full padded array, resident in VMEM
        in_specs.append(pl.BlockSpec((dims_pad[l], dims_pad[l + 1]),
                                     lambda i: (0, 0), pipeline_mode=resident))
    for l in range(n_layers):   # biases: (1, N_pad), resident in VMEM
        in_specs.append(pl.BlockSpec((1, dims_pad[l + 1]),
                                     lambda i: (0, 0), pipeline_mode=resident))

    out = pl.pallas_call(
        _make_fused_mlp_kernel(n_layers),
        out_shape=jax.ShapeDtypeStruct((m_pad, dims_pad[-1]), jnp.float32),
        grid=(m_pad // tm,),
        in_specs=in_specs,
        out_specs=pl.BlockSpec((tm, dims_pad[-1]), lambda i: (i, 0)),
        compiler_params=pltpu.CompilerParams(
            dimension_semantics=("parallel",),        # megacore shard batch tiles
            vmem_limit_bytes=vmem_limit),
    )(x_p, *ws_p, *bs_p)
    return out[:M, :out_features]


# ---------------------------------------------------------------------------
# Tiled per-layer fallback: (M, N, K) grid, f32 accumulator, bias+ReLU epilogue
# ---------------------------------------------------------------------------
def _tiled_linear_relu_kernel(x_ref, w_ref, b_ref, o_ref, acc_ref):
    k = pl.program_id(2)

    @pl.when(k == 0)
    def _init():
        acc_ref[...] = jnp.zeros_like(acc_ref)

    acc_ref[...] += jnp.dot(
        x_ref[...].astype(jnp.bfloat16),
        w_ref[...].astype(jnp.bfloat16),
        preferred_element_type=jnp.float32)

    @pl.when(k == pl.num_programs(2) - 1)
    def _epilogue():
        o_ref[...] = jnp.maximum(acc_ref[...] + b_ref[...], 0.0).astype(o_ref.dtype)


def linear_relu_tiled(x, w_t, b, *, out_dtype=jnp.float32, tm=512, tn=512, tk=1024):
    """y = relu(x @ w_t + b), tiled (M, N, K) grid, lane-dense padded tiles.

    Default tiles (512, 512, 1024) are 256-aligned for the v6e/v7x MXU and
    total ~9 MiB double-buffered per step -- well under the scoped VMEM limit
    on every generation while keeping the kernel off the HBM roofline.
    """
    M, K = x.shape
    K2, N = w_t.shape
    assert K == K2
    vmem_limit, _ = _vmem_budgets()

    tm_eff = min(tm, _round_up(M, _SUBLANE))
    m_pad = _round_up(M, tm_eff)
    k_pad = _round_up(K, _LANE)
    n_pad = _round_up(N, _LANE)
    tk_eff = _pick_tile(k_pad, tk)
    tn_eff = _pick_tile(n_pad, tn)

    x_p = _pad_rows_cols(x, m_pad, k_pad)
    w_p = _pad_rows_cols(w_t, k_pad, n_pad)
    b_p = jnp.pad(b, (0, n_pad - N)).reshape(1, -1)

    out = pl.pallas_call(
        _tiled_linear_relu_kernel,
        out_shape=jax.ShapeDtypeStruct((m_pad, n_pad), out_dtype),
        grid=(m_pad // tm_eff, n_pad // tn_eff, k_pad // tk_eff),
        in_specs=[
            pl.BlockSpec((tm_eff, tk_eff), lambda i, j, k: (i, k)),
            pl.BlockSpec((tk_eff, tn_eff), lambda i, j, k: (k, j)),
            pl.BlockSpec((1, tn_eff), lambda i, j, k: (0, j)),
        ],
        out_specs=pl.BlockSpec((tm_eff, tn_eff), lambda i, j, k: (i, j)),
        scratch_shapes=[pltpu.VMEM((tm_eff, tn_eff), jnp.float32)],
        compiler_params=pltpu.CompilerParams(
            dimension_semantics=("parallel", "parallel", "arbitrary"),
            vmem_limit_bytes=vmem_limit),
    )(x_p, w_p, b_p)
    return out[:M, :N]


# ---------------------------------------------------------------------------
# Parameters + forward
# ---------------------------------------------------------------------------
def init_mlp_params(key, input_size, fc_dims):
    """Shapes/init matching the PyTorch module; weights stored transposed
    [in, out] in bf16 (MXU input dtype), biases in f32."""
    layer_dims = [input_size] + list(fc_dims)
    params = []
    for i in range(len(layer_dims) - 1):
        fan_in, fan_out = layer_dims[i], layer_dims[i + 1]
        key, kw, kb = jax.random.split(key, 3)
        limit = math.sqrt(6.0 / (fan_in + fan_out))          # xavier_uniform_
        w = jax.random.uniform(kw, (fan_out, fan_in), jnp.float32, -limit, limit)
        b_bound = 1.0 / math.sqrt(fan_in)                    # nn.Linear default bias
        b = jax.random.uniform(kb, (fan_out,), jnp.float32, -b_bound, b_bound)
        params.append((w.T.astype(jnp.bfloat16), b))
    return params


def mlp_forward(x, params):
    """Forward pass of MLP (stack of Linear->ReLU); identity if fc_dims is empty."""
    if not params:
        return x

    orig_shape = x.shape
    if x.ndim != 2:                       # nn.Linear applies to the last dim
        x = x.reshape(-1, orig_shape[-1])

    M, in_features = x.shape
    plan = _fused_plan(M, in_features, params)
    if plan is not None:
        y = _fused_mlp(x, params, plan)
    else:
        # Large layers: per-layer tiled kernels. Intermediate activations go
        # back to HBM in bf16 (halves inter-layer traffic; the next layer's
        # matmul consumes bf16 anyway); final layer stays f32.
        y = x
        n_layers = len(params)
        for l, (w_t, b) in enumerate(params):
            last = l == n_layers - 1
            y = linear_relu_tiled(
                y, w_t, b, out_dtype=jnp.float32 if last else jnp.bfloat16)

    if len(orig_shape) != 2:
        y = y.reshape(*orig_shape[:-1], y.shape[-1])
    return y


def mlp_reference(x, params):
    """Pure-JAX reference using the same bf16-matmul / f32-accumulate precision."""
    y = x
    for w_t, b in params:
        y = jnp.maximum(
            jnp.dot(y.astype(jnp.bfloat16), w_t.astype(jnp.bfloat16),
                    preferred_element_type=jnp.float32) + b, 0.0)
    return y


if __name__ == "__main__":
    key = jax.random.PRNGKey(0)
    batch = 8
    input_size = 32
    fc_dims = [64, 32]

    k_x, k_p, k_t = jax.random.split(key, 3)
    x = jax.random.normal(k_x, (batch, input_size), dtype=jnp.float32)
    params = init_mlp_params(k_p, input_size, fc_dims)

    # Fused path (weights resident, Buffered(1), single pallas_call).
    fwd = jax.jit(lambda xx: mlp_forward(xx, params))
    y = jax.block_until_ready(fwd(x))

    y_ref = mlp_reference(x, params)
    assert y.shape == (batch, fc_dims[-1])
    assert jnp.allclose(y, y_ref, atol=1e-3, rtol=1e-3), float(
        jnp.max(jnp.abs(y - y_ref)))

    # Exercise the tiled fallback path: multi-tile (M, N, K) grid with the K
    # accumulator epilogue, bf16 intermediate activation -> f32 final layer.
    k_a, k_w1, k_b1, k_w2, k_b2 = jax.random.split(k_t, 5)
    M2, K2, H2, N2 = 256, 1024, 256, 128
    x2 = jax.random.normal(k_a, (M2, K2), dtype=jnp.float32)
    w1 = (jax.random.normal(k_w1, (K2, H2), jnp.float32) * 0.03).astype(jnp.bfloat16)
    b1 = jax.random.normal(k_b1, (H2,), jnp.float32) * 0.1
    w2 = (jax.random.normal(k_w2, (H2, N2), jnp.float32) * 0.03).astype(jnp.bfloat16)
    b2 = jax.random.normal(k_b2, (N2,), jnp.float32) * 0.1

    h2 = linear_relu_tiled(x2, w1, b1, out_dtype=jnp.bfloat16,
                           tm=128, tn=128, tk=512)        # multi-step M/N/K grid
    y2 = jax.block_until_ready(linear_relu_tiled(h2, w2, b2, out_dtype=jnp.float32))

    h2_ref = jnp.maximum(
        jnp.dot(x2.astype(jnp.bfloat16), w1, preferred_element_type=jnp.float32) + b1,
        0.0)
    y2_ref = jnp.maximum(
        jnp.dot(h2_ref.astype(jnp.bfloat16), w2,
                preferred_element_type=jnp.float32) + b2,
        0.0)
    assert jnp.allclose(y2, y2_ref, atol=5e-2, rtol=5e-2), float(
        jnp.max(jnp.abs(y2 - y2_ref)))

    print("KERNEL_OK")
</pallas_src>

<mosaic_0001>
module attributes {stable_mosaic.version = 11 : i64} {
  func.func @kernel(%arg0: i32, %arg1: memref<8x128xf32, #tpu.memory_space<vmem>>, %arg2: memref<128x128xbf16, #tpu.memory_space<vmem>>, %arg3: memref<128x128xbf16, #tpu.memory_space<vmem>>, %arg4: memref<1x128xf32, #tpu.memory_space<vmem>>, %arg5: memref<1x128xf32, #tpu.memory_space<vmem>>, %arg6: memref<8x128xf32, #tpu.memory_space<vmem>>) attributes {dimension_semantics = [#tpu.dimension_semantics<parallel>], iteration_bounds = array<i64: 1>, scalar_prefetch = 0 : i64, scratch_operands = 0 : i64, tpu.core_type = #tpu.core_type<tc>, window_params = [{transform_indices = @transform_0, window_bounds = array<i64: 8, 128>}, {pipeline_mode = #tpu.pipeline_mode<synchronous>, transform_indices = @transform_1, window_bounds = array<i64: 128, 128>}, {pipeline_mode = #tpu.pipeline_mode<synchronous>, transform_indices = @transform_2, window_bounds = array<i64: 128, 128>}, {pipeline_mode = #tpu.pipeline_mode<synchronous>, transform_indices = @transform_3, window_bounds = array<i64: 1, 128>}, {pipeline_mode = #tpu.pipeline_mode<synchronous>, transform_indices = @transform_4, window_bounds = array<i64: 1, 128>}, {transform_indices = @transform_5, window_bounds = array<i64: 8, 128>}]} {
    %c0 = arith.constant 0 : index
    %c0_0 = arith.constant 0 : index
    %0 = vector.load %arg1[%c0, %c0_0] : memref<8x128xf32, #tpu.memory_space<vmem>>, vector<8x128xf32>
    %1 = arith.truncf %0 : vector<8x128xf32> to vector<8x128xbf16>
    %c0_1 = arith.constant 0 : index
    %c0_2 = arith.constant 0 : index
    %2 = vector.load %arg2[%c0_1, %c0_2] : memref<128x128xbf16, #tpu.memory_space<vmem>>, vector<128x128xbf16>
    %cst = arith.constant dense<0.000000e+00> : vector<8x128xf32>
    %3 = tpu.matmul %1, %2, %cst {dimension_numbers = #tpu.dot_dimension_numbers<[1], [0], [0], [1], [0, 0, 1, 1], [], []>} : vector<8x128xbf16>, vector<128x128xbf16>, vector<8x128xf32> -> vector<8x128xf32>
    %c0_3 = arith.constant 0 : index
    %c0_4 = arith.constant 0 : index
    %4 = vector.load %arg4[%c0_3, %c0_4] : memref<1x128xf32, #tpu.memory_space<vmem>>, vector<1x128xf32>
    %5 = vector.broadcast %4 : vector<1x128xf32> to vector<8x128xf32>
    %6 = arith.addf %3, %5 : vector<8x128xf32>
    %cst_5 = arith.constant 0.000000e+00 : f32
    %7 = vector.broadcast %cst_5 : f32 to vector<8x128xf32>
    %8 = arith.maximumf %6, %7 : vector<8x128xf32>
    %9 = arith.truncf %8 : vector<8x128xf32> to vector<8x128xbf16>
    %c0_6 = arith.constant 0 : index
    %c0_7 = arith.constant 0 : index
    %10 = vector.load %arg3[%c0_6, %c0_7] : memref<128x128xbf16, #tpu.memory_space<vmem>>, vector<128x128xbf16>
    %cst_8 = arith.constant dense<0.000000e+00> : vector<8x128xf32>
    %11 = tpu.matmul %9, %10, %cst_8 {dimension_numbers = #tpu.dot_dimension_numbers<[1], [0], [0], [1], [0, 0, 1, 1], [], []>} : vector<8x128xbf16>, vector<128x128xbf16>, vector<8x128xf32> -> vector<8x128xf32>
    %c0_9 = arith.constant 0 : index
    %c0_10 = arith.constant 0 : index
    %12 = vector.load %arg5[%c0_9, %c0_10] : memref<1x128xf32, #tpu.memory_space<vmem>>, vector<1x128xf32>
    %13 = vector.broadcast %12 : vector<1x128xf32> to vector<8x128xf32>
    %14 = arith.addf %11, %13 : vector<8x128xf32>
    %cst_11 = arith.constant 0.000000e+00 : f32
    %15 = vector.broadcast %cst_11 : f32 to vector<8x128xf32>
    %16 = arith.maximumf %14, %15 : vector<8x128xf32>
    %c0_12 = arith.constant 0 : index
    %c0_13 = arith.constant 0 : index
    %17 = vector.load %arg6[%c0_12, %c0_13] : memref<8x128xf32, #tpu.memory_space<vmem>>, vector<8x128xf32>
    tpu.vector_store %arg6[%c0_12, %c0_13], %16 {strides = array<i32>} : memref<8x128xf32, #tpu.memory_space<vmem>>, vector<8x128xf32>,
    return
  }
  func.func @transform_0(%arg0: i32) -> (i32, i32) {
    %c0_i32 = arith.constant 0 : i32
    %c0_i32_0 = arith.constant 0 : i32
    return %arg0, %c0_i32 : i32, i32
  }
  func.func @transform_1(%arg0: i32) -> (i32, i32) {
    %c0_i32 = arith.constant 0 : i32
    %c0_i32_0 = arith.constant 0 : i32
    %c0_i32_1 = arith.constant 0 : i32
    return %c0_i32, %c0_i32_0 : i32, i32
  }
  func.func @transform_2(%arg0: i32) -> (i32, i32) {
    %c0_i32 = arith.constant 0 : i32
    %c0_i32_0 = arith.constant 0 : i32
    %c0_i32_1 = arith.constant 0 : i32
    return %c0_i32, %c0_i32_0 : i32, i32
  }
  func.func @transform_3(%arg0: i32) -> (i32, i32) {
    %c0_i32 = arith.constant 0 : i32
    %c0_i32_0 = arith.constant 0 : i32
    %c0_i32_1 = arith.constant 0 : i32
    return %c0_i32, %c0_i32_0 : i32, i32
  }
  func.func @transform_4(%arg0: i32) -> (i32, i32) {
    %c0_i32 = arith.constant 0 : i32
    %c0_i32_0 = arith.constant 0 : i32
    %c0_i32_1 = arith.constant 0 : i32
    return %c0_i32, %c0_i32_0 : i32, i32
  }
  func.func @transform_5(%arg0: i32) -> (i32, i32) {
    %c0_i32 = arith.constant 0 : i32
    %c0_i32_0 = arith.constant 0 : i32
    return %arg0, %c0_i32 : i32, i32
  }
}

</mosaic_0001>

<bundles_post_ra>
// kernel: _lambda_.1
= control target key start
LH: loop header
LB: loop body
LE: loop exit
PB: predicated region body
PF: predicated region fallthrough
CT: control target
= control target key end

     0   :  { %10 = vsyncpa [#allocation3], 0  ;;  %s457_s0 = inlined_call_operand.vmem [shape: f32[8,128], index: 0, kind: input, shape index: {}]   ;;  %s458_s1 = inlined_call_operand.hbm [shape: bf16[128,128], index: 1, kind: input, shape index: {}]   ;;  %s459_s2 = inlined_call_operand.hbm [shape: bf16[128,128], index: 2, kind: input, shape index: {}]   ;;  %s460_s3 = inlined_call_operand.vmem [shape: f32[1,128], index: 3, kind: input, shape index: {}]   ;;  %s461_s4 = inlined_call_operand.vmem [shape: f32[1,128], index: 4, kind: input, shape index: {}]   ;;  %s462_s5 = inlined_call_operand.hbm [shape: f32[8,128], index: 5, kind: output, shape index: {}]  }
   0x1   :  { %11 = vsyncpa [#allocation6], 0 }
   0x2   :  { %12 = vsyncpa [#allocation4], 0  ;;  %s19_s20 = sshll.u32 %s458_s1, 4  ;;  %s404_s21 = smov [#allocation2]   ;;  %s20_s20 = int_to_ptr.hbm [resolvable:$true] %s19_s20 }
   0x3   :  { %s21_s22 = sshll.u32 %s404_s21, 4  ;;  %s32_s25 = sshll.u32 %s459_s2, 4  ;;  %s22_s22 = int_to_ptr.vmem [resolvable:$true] %s21_s22  ;;  %s33_s25 = int_to_ptr.hbm [resolvable:$true] %s32_s25 }
   0x4   :  { %s405_s26 = smov 64   ;;  %s406_s27 = smov 4  }
   0x5   :  { %27 = dma.hbm_to_vmem [thread:$0]  %s20_s20, 1024, %s22_s22, [#allocation3], %s405_s26, %s405_s26, %s406_s27  }
   0x6   :  { %s407_s28 = smov [#allocation5]  }
   0x7   :  { %s34_s29 = sshll.u32 %s407_s28, 4  ;;  %s35_s29 = int_to_ptr.vmem [resolvable:$true] %s34_s29 }
   0x8   :  { %40 = dma.hbm_to_vmem [thread:$0]  %s33_s25, 1024, %s35_s29, [#allocation6], %s405_s26, %s405_s26, %s406_s27  }
   0x9   :  { %398 = dma.done.wait [#allocation3], 1024  }
   0xa   :  { %399 = vsyncadd [#allocation3], 4294966272 }
   0xb   :  { %400 = dma.done.wait [#allocation6], 1024  }
   0xc   :  { %401 = vsyncadd [#allocation6], 4294966272  ;;  %v310_v0 = vld [vmem:[#allocation2 + $0x38] sm:$0xff]  ;;  %v309_v1 = vld [vmem:[#allocation2 + $0x30] sm:$0xff]  ;;  %s228_s12 = sshll.u32 %s462_s5, 4  ;;  %s229_s12 = int_to_ptr.hbm [resolvable:$true] %s228_s12 }
   0xd   :  { %123 = vmatpush.bf16.msra.mxu0 %v310_v0  ;;  %v318_v2 = vld [vmem:[#allocation5 + $0x38] sm:$0xff]  ;;  %v317_v3 = vld [vmem:[#allocation5 + $0x30] sm:$0xff]  ;;  %v308_v4 = vld [vmem:[#allocation2 + $0x28] sm:$0xff] }
   0xe   :  { %206 = vmatpush.bf16.msra.mxu1 %v318_v2  ;;  %v316_v5 = vld [vmem:[#allocation5 + $0x28] sm:$0xff]  ;;  %v307_v6 = vld [vmem:[#allocation2 + $0x20] sm:$0xff]  ;;  %v306_v8 = vld [vmem:[#allocation2 + $0x18] sm:$0xff] }
   0xf   :  { %v315_v7 = vld [vmem:[#allocation5 + $0x20] sm:$0xff]  ;;  %v314_v9 = vld [vmem:[#allocation5 + $0x18] sm:$0xff]  ;;  %v305_v10 = vld [vmem:[#allocation2 + $0x10] sm:$0xff] }
  0x10   :  { %v313_v11 = vld [vmem:[#allocation5 + $0x10] sm:$0xff]  ;;  %v304_v12 = vld [vmem:[#allocation2 + $0x8] sm:$0xff]  ;;  %v303_v13 = vld [vmem:[#allocation2] sm:$0xff] }
  0x11   :  { %124 = vmatpush.bf16.msra.mxu0 %v309_v1  ;;  %v53_v14 = vld [vmem:[%s457_s0] sm:$0xff]  ;;  %v312_v16 = vld [vmem:[#allocation5 + $0x8] sm:$0xff]  ;;  %s408_s0 = smov [#allocation7]  }
  0x12   :  { %207 = vmatpush.bf16.msra.mxu1 %v317_v3  ;;  %v54_v15 = vpack.c.bf16 %v53_v14, %v53_v14  ;;  %v311_v17 = vld [vmem:[#allocation5] sm:$0xff]  ;;  %s226_s9 = sshll.u32 %s408_s0, 4  ;;  %s227_s9 = int_to_ptr.vmem [resolvable:$true] %s226_s9 }
  0x13   :  { %v324_v18 = vld [vmem:[%s460_s3] ss:$0 sm:$0xff] }
  0x14   :  { %v325_v24 = vld [vmem:[%s461_s4] ss:$0 sm:$0xff] }
  0x15   :  { %125 = vmatpush.bf16.msra.mxu0 %v308_v4 }
  0x16   :  { %208 = vmatpush.bf16.msra.mxu1 %v316_v5 }
  0x19   :  { %126 = vmatpush.bf16.msra.mxu0 %v307_v6 }
  0x1a   :  { %209 = vmatpush.bf16.msra.mxu1 %v315_v7 }
  0x1d   :  { %127 = vmatpush.bf16.msra.mxu0 %v306_v8 }
  0x1e   :  { %210 = vmatpush.bf16.msra.mxu1 %v314_v9 }
  0x21   :  { %128 = vmatpush.bf16.msra.mxu0 %v305_v10 }
  0x22   :  { %211 = vmatpush.bf16.msra.mxu1 %v313_v11 }
  0x25   :  { %129 = vmatpush.bf16.msra.mxu0 %v304_v12 }
  0x26   :  { %212 = vmatpush.bf16.msra.mxu1 %v312_v16 }
  0x29   :  { %130 = vmatpush.bf16.msra.mxu0 %v303_v13 }
  0x2a   :  { %213 = vmatpush.bf16.msra.mxu1 %v311_v17 }
  0x2c   :  { %131 = vmatmul.bf16.vlgmr.msra.gmra.mxu0 %v54_v15 }
  0xa9   :  { %v132_v19 = vpop.f32.mrf.mxu0 }
  0xaa   :  { %v133_v20 = vadd.f32 %v324_v18, %v132_v19 }
  0xac   :  { %v136_v21 = vmax.f32 %v133_v20, 0.0 }
  0xae   :  { %v137_v22 = vpack.c.bf16 %v136_v21, %v136_v21 }
  0xb0   :  { %214 = vmatmul.bf16.vlgmr.msra.gmra.mxu1 %v137_v22 }
  0xb1   :  { %v134_v23 = vpop.f32.mrf.mxu0 }
 0x12d   :  { %v215_v25 = vpop.f32.mrf.mxu1 }
 0x12e   :  { %v216_v26 = vadd.f32 %v325_v24, %v215_v25 }
 0x130   :  { %v219_v27 = vmax.f32 %v216_v26, 0.0 }
 0x132   :  { %220 = vst [vmem:[#allocation7] sm:$0xff] %v219_v27 }
 0x133   :  { %231 = dma.vmem_to_hbm [thread:$0]  %s227_s9, 128, %s229_s12, [#allocation4]  }
 0x135   :  { %v217_v28 = vpop.f32.mrf.mxu1 }
 0x136   :  { %402 = dma.done.wait [#allocation4], 128  }
 0x137   :  { %403 = vsyncadd [#allocation4], 4294967168 }
 0x138   :  { %236 = vsyncpa [#allocation3], 1 }
 0x139   :  { %237 = vsyncpa [#allocation6], 1 }
 0x13a   :  { %238 = vsyncpa [#allocation4], 1 }

</bundles_post_ra>
